<compile_context>
chip_gen: v7x
topology: tpu7x:2x2x1
jax: 0.10.0
libtpu: 0.0.40
codegen_flags: <defaults>
</compile_context>

<pallas_src>
import jax
import jax.numpy as jnp
from jax import lax
from jax.experimental import pallas as pl
from jax.experimental.pallas import tpu as pltpu

_PI = 3.141592653589793
_PI_PROTATE = 3.1415926235897933   # replicates the upstream module's constant


# ---------------------------------------------------------------------------
# Small in-kernel helpers
# ---------------------------------------------------------------------------
def _dot_nt(a, b):
    """a: (1, H), b: (R, H) -> (1, R) on the MXU (f32 accumulate, full precision)."""
    return lax.dot_general(
        a, b, dimension_numbers=(((1,), (1,)), ((), ())),
        preferred_element_type=jnp.float32,
        precision=lax.Precision.HIGHEST)


def _rowsum_lane(x):
    """(R, D) -> (1, R): per-row sum along D, emitted lane-dense via the MXU."""
    ones = jnp.ones((1, x.shape[-1]), dtype=jnp.float32)
    return _dot_nt(ones, x)


def _plain_scores(v, f, r, model_name, var_is_head, gamma, inv_scale, modulus):
    """TransE / pRotatE. v: (R, D) varying rows; f, r: (1, D) or (R, D)."""
    if var_is_head:
        s = v + (r - f)          # head-batch: head + (relation - tail)
    else:
        s = (f + r) - v          # single / tail-batch: head + relation - tail
    if model_name == "TransE":
        return gamma - _rowsum_lane(jnp.abs(s))
    # pRotatE: phases = values * (pi / embedding_range); scale folded into one mul.
    return gamma - _rowsum_lane(jnp.abs(jnp.sin(s * inv_scale))) * modulus


def _rotate_scores(rv, iv, rf, jf, rr, ir, var_is_head, gamma, inv_scale):
    """RotatE as written in the module (rotation always applied to the fix/tail
    operand; cos/sin taken from the two different relation halves)."""
    cr = jnp.cos(rr * inv_scale)
    sr = jnp.sin(ir * inv_scale)
    if var_is_head:                        # var = head, fix = tail
        re_s = (cr * rf + sr * jf) - rv
        im_s = (cr * jf - sr * rf) - iv
    else:                                  # var = tail, fix = head
        re_s = (cr * rv + sr * iv) - rf
        im_s = (cr * iv - sr * rv) - jf
    return gamma - _rowsum_lane(jnp.sqrt(re_s * re_s + im_s * im_s))


def _complex_scores(rv, iv, rf, jf, rr, ir, var_is_head):
    if var_is_head:                        # head-batch: var = head, fix = tail
        re_c = rr * rf + ir * jf
        im_c = rr * jf - ir * rf
    else:                                  # single / tail-batch: var = tail, fix = head
        re_c = rf * rr - jf * ir
        im_c = rf * ir + jf * rr
    if re_c.shape[0] == 1:
        # Neg-batch modes: the whole score is two MXU contractions.
        return _dot_nt(re_c, rv) + _dot_nt(im_c, iv)
    # Single mode: elementwise combine then one MXU reduction.
    return _rowsum_lane(rv * re_c + iv * im_c)


# ---------------------------------------------------------------------------
# Kernel factories
# ---------------------------------------------------------------------------
def _make_plain_kernel(model_name, var_is_head, gamma, inv_scale, modulus, lead1):
    """TransE / pRotatE.  lead1: blocks carry a leading size-1 batch dim."""
    def _ld(ref):
        x = ref[0] if lead1 else ref[...]
        return x.astype(jnp.float32)

    def kernel(var_ref, fix_ref, rel_ref, o_ref):
        row = _plain_scores(_ld(var_ref), _ld(fix_ref), _ld(rel_ref),
                            model_name, var_is_head, gamma, inv_scale, modulus)
        if lead1:
            o_ref[0] = row
        else:
            o_ref[...] = row
    return kernel


def _make_split_kernel(model_name, var_is_head, gamma, inv_scale, half,
                       in_kernel_split, lead1):
    """RotatE / ComplEx with re/im halves either as separate lane-aligned refs
    (half % 128 == 0) or sliced out of the full block inside the kernel."""
    def _ld(ref):
        x = ref[0] if lead1 else ref[...]
        return x.astype(jnp.float32)

    def _score(rv, iv, rf, jf, rr, ir):
        if model_name == "RotatE":
            return _rotate_scores(rv, iv, rf, jf, rr, ir, var_is_head, gamma, inv_scale)
        return _complex_scores(rv, iv, rf, jf, rr, ir, var_is_head)

    def _st(o_ref, row):
        if lead1:
            o_ref[0] = row
        else:
            o_ref[...] = row

    if in_kernel_split:
        def kernel(var_ref, fix_ref, rel_ref, o_ref):
            v, f, r = _ld(var_ref), _ld(fix_ref), _ld(rel_ref)
            _st(o_ref, _score(v[:, :half], v[:, half:],
                              f[:, :half], f[:, half:],
                              r[:, :half], r[:, half:]))
    else:
        def kernel(rv_ref, iv_ref, rf_ref, if_ref, rr_ref, ir_ref, o_ref):
            _st(o_ref, _score(_ld(rv_ref), _ld(iv_ref), _ld(rf_ref),
                              _ld(if_ref), _ld(rr_ref), _ld(ir_ref)))
    return kernel


# ---------------------------------------------------------------------------
# Pallas wrappers
# ---------------------------------------------------------------------------
def _vmem_budget():
    try:
        cap = int(pltpu.get_tpu_info().vmem_capacity_bytes)
    except Exception:
        cap = 64 * 1024 * 1024              # conservative (v7x per-core VMEM)
    # <=48 MiB scoped limit on 64 MiB parts (v7x), <=64 MiB on 128 MiB parts.
    return int(min(64 * 1024 * 1024, (cap * 3) // 4))


def _score_single(model_name, var_is_head, gamma, inv_scale, modulus,
                  var, fix, rel, half, split, vmem_limit):
    """Single mode (one candidate per row): tile the batch axis itself so the
    output row is lane-dense and sublanes are filled.  var/fix/rel: (B, D)."""
    B, De = var.shape
    Dr = rel.shape[-1]
    itemsize = var.dtype.itemsize
    target = min(2 * 1024 * 1024, vmem_limit // 12)   # 3 streamed operands, 2 buffers each
    cap = max(128, min(2048, ((target // (De * itemsize)) // 128) * 128))
    tb = B if B <= cap else cap
    grid = (pl.cdiv(B, tb),)

    if split:
        lane_aligned = (half % 128 == 0)
        kernel = _make_split_kernel(model_name, var_is_head, gamma, inv_scale,
                                    half, in_kernel_split=not lane_aligned,
                                    lead1=False)
        if lane_aligned:
            operands = (var, var, fix, fix, rel, rel)
            in_specs = [
                pl.BlockSpec((tb, half), lambda i: (i, 0)),
                pl.BlockSpec((tb, half), lambda i: (i, 1)),
                pl.BlockSpec((tb, half), lambda i: (i, 0)),
                pl.BlockSpec((tb, half), lambda i: (i, 1)),
                pl.BlockSpec((tb, half), lambda i: (i, 0)),
                pl.BlockSpec((tb, half), lambda i: (i, 1)),
            ]
        else:
            operands = (var, fix, rel)
            in_specs = [
                pl.BlockSpec((tb, De), lambda i: (i, 0)),
                pl.BlockSpec((tb, De), lambda i: (i, 0)),
                pl.BlockSpec((tb, Dr), lambda i: (i, 0)),
            ]
    else:
        kernel = _make_plain_kernel(model_name, var_is_head, gamma, inv_scale,
                                    modulus, lead1=False)
        operands = (var, fix, rel)
        in_specs = [
            pl.BlockSpec((tb, De), lambda i: (i, 0)),
            pl.BlockSpec((tb, De), lambda i: (i, 0)),
            pl.BlockSpec((tb, Dr), lambda i: (i, 0)),
        ]

    out = pl.pallas_call(
        kernel,
        out_shape=jax.ShapeDtypeStruct((1, B), jnp.float32),
        grid=grid,
        in_specs=in_specs,
        out_specs=pl.BlockSpec((1, tb), lambda i: (0, i)),
        compiler_params=pltpu.CompilerParams(
            dimension_semantics=("parallel",),
            vmem_limit_bytes=vmem_limit),
    )(*operands)
    return out.reshape(B, 1)


def _score_pallas(model_name, var_is_head, gamma, emb_range, modulus, var, fix, rel):
    """var: (B, N, De) entity varying over the negative axis.
       fix: (B, 1, De) entity shared across the negative axis.
       rel: (B, 1, Dr) relation shared across the negative axis.
       Returns (B, N) float32 scores."""
    B, N, De = var.shape
    Dr = rel.shape[-1]
    itemsize = var.dtype.itemsize
    vmem_limit = _vmem_budget()

    split = model_name in ("RotatE", "ComplEx")
    if split:
        if De != Dr or De % 2:
            raise ValueError(
                "torch.chunk semantics in this module require entity_dim == "
                "relation_dim (and even) for %s" % model_name)
        half = De // 2
        inv_scale = _PI / emb_range
    else:
        half = 0
        inv_scale = _PI_PROTATE / emb_range      # only used by pRotatE

    if N == 1:
        return _score_single(model_name, var_is_head, gamma, inv_scale, modulus,
                             var[:, 0, :], fix[:, 0, :], rel[:, 0, :],
                             half, split, vmem_limit)

    # ---- negative-batch path: 2-D grid over (batch row, negative tile) -----
    target = min(4 * 1024 * 1024, vmem_limit // 6)    # per double-buffered varying block
    cap = max(128, min(4096, ((target // (De * itemsize)) // 128) * 128))
    tile_n = N if N <= cap else cap
    grid = (B, pl.cdiv(N, tile_n))

    if split:
        lane_aligned = (half % 128 == 0)
        kernel = _make_split_kernel(model_name, var_is_head, gamma, inv_scale,
                                    half, in_kernel_split=not lane_aligned,
                                    lead1=True)
        if lane_aligned:
            # Address the halves via block indices on the same arrays: no copies.
            operands = (var, var, fix, fix, rel, rel)
            in_specs = [
                pl.BlockSpec((1, tile_n, half), lambda b, n: (b, n, 0)),
                pl.BlockSpec((1, tile_n, half), lambda b, n: (b, n, 1)),
                pl.BlockSpec((1, 1, half), lambda b, n: (b, 0, 0)),
                pl.BlockSpec((1, 1, half), lambda b, n: (b, 0, 1)),
                pl.BlockSpec((1, 1, half), lambda b, n: (b, 0, 0)),
                pl.BlockSpec((1, 1, half), lambda b, n: (b, 0, 1)),
            ]
        else:
            # Full blocks; re/im halves are sliced inside the kernel (in-VMEM).
            operands = (var, fix, rel)
            in_specs = [
                pl.BlockSpec((1, tile_n, De), lambda b, n: (b, n, 0)),
                pl.BlockSpec((1, 1, De), lambda b, n: (b, 0, 0)),
                pl.BlockSpec((1, 1, De), lambda b, n: (b, 0, 0)),
            ]
    else:
        kernel = _make_plain_kernel(model_name, var_is_head, gamma, inv_scale,
                                    modulus, lead1=True)
        operands = (var, fix, rel)
        in_specs = [
            pl.BlockSpec((1, tile_n, De), lambda b, n: (b, n, 0)),
            pl.BlockSpec((1, 1, De), lambda b, n: (b, 0, 0)),
            pl.BlockSpec((1, 1, Dr), lambda b, n: (b, 0, 0)),
        ]

    out = pl.pallas_call(
        kernel,
        out_shape=jax.ShapeDtypeStruct((B, 1, N), jnp.float32),
        grid=grid,
        in_specs=in_specs,
        out_specs=pl.BlockSpec((1, 1, tile_n), lambda b, n: (b, 0, n)),
        compiler_params=pltpu.CompilerParams(
            dimension_semantics=("parallel", "parallel"),
            vmem_limit_bytes=vmem_limit),
    )(*operands)
    return out[:, 0, :]


# ---------------------------------------------------------------------------
# Pure-JAX reference of the PyTorch module (for in-script verification only)
# ---------------------------------------------------------------------------
def _reference_score(model_name, mode, gamma, emb_range, modulus, head, relation, tail):
    if model_name == "TransE":
        s = head + (relation - tail) if mode == "head-batch" else head + relation - tail
        return gamma - jnp.sum(jnp.abs(s), axis=2)
    if model_name == "RotatE":
        re_h, im_h = jnp.split(head, 2, axis=2)
        re_t, im_t = jnp.split(tail, 2, axis=2)
        re_r, im_r = jnp.split(relation, 2, axis=2)
        re_rel = jnp.cos(re_r / (emb_range / _PI))
        im_rel = jnp.sin(im_r / (emb_range / _PI))
        re_s = re_rel * re_t + im_rel * im_t - re_h
        im_s = re_rel * im_t - im_rel * re_t - im_h
        return gamma - jnp.sum(jnp.sqrt(re_s * re_s + im_s * im_s), axis=2)
    if model_name == "pRotatE":
        ph = head / (emb_range / _PI_PROTATE)
        pr = relation / (emb_range / _PI_PROTATE)
        pt = tail / (emb_range / _PI_PROTATE)
        s = ph + (pr - pt) if mode == "head-batch" else ph + pr - pt
        return gamma - jnp.sum(jnp.abs(jnp.sin(s)), axis=2) * modulus
    if model_name == "ComplEx":
        re_h, im_h = jnp.split(head, 2, axis=2)
        re_r, im_r = jnp.split(relation, 2, axis=2)
        re_t, im_t = jnp.split(tail, 2, axis=2)
        if mode == "head-batch":
            re_s = re_r * re_t + im_r * im_t
            im_s = re_r * im_t - im_r * re_t
            s = re_h * re_s + im_h * im_s
        else:
            re_s = re_h * re_r - im_h * im_r
            im_s = re_h * im_r + im_h * re_r
            s = re_s * re_t + im_s * im_t
        return jnp.sum(s, axis=2)
    raise ValueError("model %s not supported" % model_name)


# ---------------------------------------------------------------------------
# Module
# ---------------------------------------------------------------------------
class KGEModelPallas:
    """JAX/Pallas re-implementation of KGEModel.forward."""

    def __init__(self, model_name, nentity, nrelation, hidden_dim, gamma,
                 double_entity_embedding=False, double_relation_embedding=False,
                 seed=0, param_dtype=jnp.float32):
        self.model_name = model_name
        self.nentity = nentity
        self.nrelation = nrelation
        self.hidden_dim = hidden_dim
        self.epsilon = 2.0
        self.gamma = float(gamma)
        self.embedding_range = (self.gamma + self.epsilon) / hidden_dim
        self.entity_dim = hidden_dim * 2 if double_entity_embedding else hidden_dim
        self.relation_dim = hidden_dim * 2 if double_relation_embedding else hidden_dim

        k1, k2 = jax.random.split(jax.random.PRNGKey(seed))
        self.entity_embedding = jax.random.uniform(
            k1, (nentity, self.entity_dim), jnp.float32,
            -self.embedding_range, self.embedding_range).astype(param_dtype)
        self.relation_embedding = jax.random.uniform(
            k2, (nrelation, self.relation_dim), jnp.float32,
            -self.embedding_range, self.embedding_range).astype(param_dtype)

        self.modulus = 0.5 * self.embedding_range if model_name == "pRotatE" else 0.0
        self.pi = _PI_PROTATE

    # -- glue: embedding gathers (plain JAX); no broadcast materialization ---
    def _gather(self, sample, mode):
        ent, rel = self.entity_embedding, self.relation_embedding
        if mode == "single":
            head = ent[sample[:, 0]][:, None, :]                 # (B,1,De)
            relation = rel[sample[:, 1]][:, None, :]             # (B,1,Dr)
            tail = ent[sample[:, 2]][:, None, :]                 # (B,1,De)
            return tail, head, relation, False                   # var=tail, fix=head
        if mode == "head-batch":
            tail_part, head_part = sample
            B, N = head_part.shape
            head = ent[head_part.reshape(-1)].reshape(B, N, -1)  # varying
            relation = rel[tail_part[:, 1]][:, None, :]
            tail = ent[tail_part[:, 2]][:, None, :]              # fixed
            return head, tail, relation, True                    # var=head, fix=tail
        if mode == "tail-batch":
            head_part, tail_part = sample
            B, N = tail_part.shape
            head = ent[head_part[:, 0]][:, None, :]              # fixed
            relation = rel[head_part[:, 1]][:, None, :]
            tail = ent[tail_part.reshape(-1)].reshape(B, N, -1)  # varying
            return tail, head, relation, False                   # var=tail, fix=head
        raise ValueError("mode %s not supported" % mode)

    def forward(self, sample, mode="single"):
        var, fix, relation, var_is_head = self._gather(sample, mode)
        return _score_pallas(self.model_name, var_is_head, self.gamma,
                             self.embedding_range, self.modulus,
                             var, fix, relation)

    def forward_reference(self, sample, mode="single"):
        """Pure-JAX mirror of the torch module, for verification."""
        ent = self.entity_embedding.astype(jnp.float32)
        rel = self.relation_embedding.astype(jnp.float32)
        if mode == "single":
            head = ent[sample[:, 0]][:, None, :]
            relation = rel[sample[:, 1]][:, None, :]
            tail = ent[sample[:, 2]][:, None, :]
        elif mode == "head-batch":
            tail_part, head_part = sample
            B, N = head_part.shape
            head = ent[head_part.reshape(-1)].reshape(B, N, -1)
            relation = rel[tail_part[:, 1]][:, None, :]
            tail = ent[tail_part[:, 2]][:, None, :]
        elif mode == "tail-batch":
            head_part, tail_part = sample
            B, N = tail_part.shape
            head = ent[head_part[:, 0]][:, None, :]
            relation = rel[head_part[:, 1]][:, None, :]
            tail = ent[tail_part.reshape(-1)].reshape(B, N, -1)
        else:
            raise ValueError("mode %s not supported" % mode)
        return _reference_score(self.model_name, mode, self.gamma,
                                self.embedding_range, self.modulus,
                                head, relation, tail)


# ---------------------------------------------------------------------------
# Demo / self-check
# ---------------------------------------------------------------------------
if __name__ == "__main__":
    B, N = 2, 8
    nentity, nrelation = 64, 16

    ks = jax.random.split(jax.random.PRNGKey(0), 6)
    pos = jnp.stack([
        jax.random.randint(ks[0], (B,), 0, nentity),
        jax.random.randint(ks[1], (B,), 0, nrelation),
        jax.random.randint(ks[2], (B,), 0, nentity)], axis=1).astype(jnp.int32)
    neg_heads = jax.random.randint(ks[3], (B, N), 0, nentity).astype(jnp.int32)
    neg_tails = jax.random.randint(ks[4], (B, N), 0, nentity).astype(jnp.int32)
    # Larger than the 4096-row tile cap -> exercises the multi-tile path with a
    # masked partial last tile (no padding).
    neg_tails_big = jax.random.randint(ks[5], (B, 4500), 0, nentity).astype(jnp.int32)

    def check(model, sample, mode, tol=3e-2):
        out = model.forward(sample, mode)
        ref = model.forward_reference(sample, mode)
        out = jax.block_until_ready(out)
        assert out.shape == ref.shape, (out.shape, ref.shape)
        err = float(jnp.max(jnp.abs(out - ref)))
        assert err < tol, (model.model_name, mode, err)

    # TransE (hidden=32): single-mode batched path, head-batch, and a >4096
    # negative tail-batch (multi-tile, masked partial last tile).
    m = KGEModelPallas("TransE", nentity, nrelation, 32, gamma=12.0, seed=0)
    check(m, pos, "single")
    check(m, (pos, neg_heads), "head-batch")
    check(m, (pos, neg_tails_big), "tail-batch")

    # pRotatE (hidden=32), both negative modes.
    m = KGEModelPallas("pRotatE", nentity, nrelation, 32, gamma=12.0, seed=1)
    check(m, (pos, neg_tails), "tail-batch")
    check(m, (pos, neg_heads), "head-batch")

    # RotatE, doubled entity AND relation embeddings so that torch.chunk halves
    # line up.  hidden=32 -> half=32 exercises the in-kernel re/im slicing path.
    m = KGEModelPallas("RotatE", nentity, nrelation, 32, gamma=12.0,
                       double_entity_embedding=True, double_relation_embedding=True,
                       seed=2)
    check(m, (pos, neg_tails), "tail-batch")

    # RotatE hidden=128 -> half=128 exercises the lane-aligned block-index path.
    m = KGEModelPallas("RotatE", nentity, nrelation, 128, gamma=12.0,
                       double_entity_embedding=True, double_relation_embedding=True,
                       seed=3)
    check(m, (pos, neg_heads), "head-batch")

    # ComplEx (hidden=32, doubled both): both negative modes (MXU-folded) and
    # the batched single-mode path.
    m = KGEModelPallas("ComplEx", nentity, nrelation, 32, gamma=12.0,
                       double_entity_embedding=True, double_relation_embedding=True,
                       seed=4)
    check(m, (pos, neg_tails), "tail-batch")
    check(m, (pos, neg_heads), "head-batch")
    check(m, pos, "single")

    print("KERNEL_OK")
</pallas_src>

<mosaic_0001>
module attributes {stable_mosaic.version = 11 : i64} {
  func.func @kernel(%arg0: i32, %arg1: memref<2x32xf32, #tpu.memory_space<vmem>>, %arg2: memref<2x32xf32, #tpu.memory_space<vmem>>, %arg3: memref<2x32xf32, #tpu.memory_space<vmem>>, %arg4: memref<1x2xf32, #tpu.memory_space<vmem>>) attributes {dimension_semantics = [#tpu.dimension_semantics<parallel>], iteration_bounds = array<i64: 1>, scalar_prefetch = 0 : i64, scratch_operands = 0 : i64, tpu.core_type = #tpu.core_type<tc>, window_params = [{transform_indices = @transform_0, window_bounds = array<i64: 2, 32>}, {transform_indices = @transform_1, window_bounds = array<i64: 2, 32>}, {transform_indices = @transform_2, window_bounds = array<i64: 2, 32>}, {transform_indices = @transform_3, window_bounds = array<i64: 1, 2>}]} {
    %c0 = arith.constant 0 : index
    %c0_0 = arith.constant 0 : index
    %0 = vector.load %arg1[%c0, %c0_0] : memref<2x32xf32, #tpu.memory_space<vmem>>, vector<2x32xf32>
    %c0_1 = arith.constant 0 : index
    %c0_2 = arith.constant 0 : index
    %1 = vector.load %arg2[%c0_1, %c0_2] : memref<2x32xf32, #tpu.memory_space<vmem>>, vector<2x32xf32>
    %c0_3 = arith.constant 0 : index
    %c0_4 = arith.constant 0 : index
    %2 = vector.load %arg3[%c0_3, %c0_4] : memref<2x32xf32, #tpu.memory_space<vmem>>, vector<2x32xf32>
    %3 = arith.addf %1, %2 : vector<2x32xf32>
    %4 = arith.subf %3, %0 : vector<2x32xf32>
    %5 = math.absf %4 : vector<2x32xf32>
    %cst = arith.constant 1.000000e+00 : f32
    %6 = vector.broadcast %cst : f32 to vector<1x32xf32>
    %cst_5 = arith.constant dense<0.000000e+00> : vector<1x2xf32>
    %7 = tpu.matmul %6, %5, %cst_5 {dimension_numbers = #tpu.dot_dimension_numbers<[1], [1], [0], [0], [0, 0, 1, 0], [], []>, precision = #tpu.contract_precision<fp32>} : vector<1x32xf32>, vector<2x32xf32>, vector<1x2xf32> -> vector<1x2xf32>
    %cst_6 = arith.constant 1.200000e+01 : f32
    %8 = vector.broadcast %cst_6 : f32 to vector<1x2xf32>
    %9 = arith.subf %8, %7 : vector<1x2xf32>
    %c0_7 = arith.constant 0 : index
    %c0_8 = arith.constant 0 : index
    %10 = vector.load %arg4[%c0_7, %c0_8] : memref<1x2xf32, #tpu.memory_space<vmem>>, vector<1x2xf32>
    tpu.vector_store %arg4[%c0_7, %c0_8], %9 {strides = array<i32>} : memref<1x2xf32, #tpu.memory_space<vmem>>, vector<1x2xf32>,
    return
  }
  func.func @transform_0(%arg0: i32) -> (i32, i32) {
    %c0_i32 = arith.constant 0 : i32
    %c0_i32_0 = arith.constant 0 : i32
    return %arg0, %c0_i32 : i32, i32
  }
  func.func @transform_1(%arg0: i32) -> (i32, i32) {
    %c0_i32 = arith.constant 0 : i32
    %c0_i32_0 = arith.constant 0 : i32
    return %arg0, %c0_i32 : i32, i32
  }
  func.func @transform_2(%arg0: i32) -> (i32, i32) {
    %c0_i32 = arith.constant 0 : i32
    %c0_i32_0 = arith.constant 0 : i32
    return %arg0, %c0_i32 : i32, i32
  }
  func.func @transform_3(%arg0: i32) -> (i32, i32) {
    %c0_i32 = arith.constant 0 : i32
    %c0_i32_0 = arith.constant 0 : i32
    return %c0_i32, %arg0 : i32, i32
  }
}

</mosaic_0001>

<bundles_post_ra>
// kernel: tpu_custom_call.1
= control target key start
LH: loop header
LB: loop body
LE: loop exit
PB: predicated region body
PF: predicated region fallthrough
CT: control target
= control target key end

     0   :  { %8 = vsyncpa [#allocation3], 0  ;;  %s679_s0 = inlined_call_operand.hbm [shape: f32[2,32], index: 0, kind: input, shape index: {}]   ;;  %s680_s1 = inlined_call_operand.vmem [shape: f32[2,32], index: 1, kind: input, shape index: {}]   ;;  %s681_s2 = inlined_call_operand.vmem [shape: f32[2,32], index: 2, kind: input, shape index: {}]   ;;  %s682_s3 = inlined_call_operand.hbm [shape: f32[1,2], index: 3, kind: output, shape index: {}]  }
   0x1   :  { %9 = vsyncpa [#allocation4], 0  ;;  %s612_s12 = smov [#allocation2]   ;;  %s564_s16 = scalar_lea.hbm %s679_s0, 32 }
   0x2   :  { %s16_s13 = sshll.u32 %s612_s12, 4  ;;  %p565_p0 = scmp.ne.s32.totalorder %s679_s0, %s564_s16  ;;  %s17_s13 = int_to_ptr.vmem [resolvable:$true] %s16_s13 }
   0x3   :  { %p568_p1 = scmp.lt.u32.totalorder %s564_s16, %s679_s0 }
   0x5   :  { %p570_p2 = pnand %p568_p1, %p565_p0 }
   0x7   :  { %573 = shalt.err (!%p570_p2)
}
   0x8   :  { %s574_s21 = scalar_lea.vmem %s17_s13, 32  ;;  %p579_p4 = scmp.lt.s32.totalorder %s17_s13, %s17_s13 }
   0x9   :  { %p575_p3 = scmp.ne.s32.totalorder %s17_s13, %s574_s21  ;;  %p580_p5 = scmp.lt.s32.totalorder %s574_s21, %s574_s21 }
   0xb   :  { %p581_p6 = por %p580_p5, %p579_p4 }
   0xd   :  { %p582_p7 = pnand %p581_p6, %p575_p3 }
   0xf   :  { %585 = shalt.err (!%p582_p7)
}
  0x10   :  { %19 = dma.hbm_to_vmem [thread:$0]  %s679_s0, 32, %s17_s13, [#allocation3]  }
  0x11   :  { %608 = dma.done.wait [#allocation3], 32  }
  0x12   :  { %609 = vsyncadd [#allocation3], 4294967264  ;;  %vm33_vm0 = vcmask 261120   ;;  %v613_v0 = vmov 0.0   ;;  %v614_v1 = vmov 0   ;;  %vm615_vm1 = vmmov 0  }
  0x13   :  { %519 = vmatprep.subr.mxu1 %v613_v0  ;;  %534 = vmatprep.subr.mxu0 %v613_v0  ;;  %v35_v2 = vsel %vm33_vm0, 1.0, %v614_v1  ;;  %v27_v4 = vld [vmem:[#allocation2] sm:$0x3]  ;;  %v616_v19 = vmov 1.0   ;;  %vm487_vm2 = vcmask 8192  }
  0x14   :  { %521 = vmatprep.mubr.msk.f32.mxu1 %vm615_vm1, %v613_v0  ;;  %536 = vmatprep.mubr.msk.f32.mxu0 %vm615_vm1, %v613_v0  ;;  %v107_v3 = vsub.f32 %v35_v2, %v35_v2  ;;  %v28_v5 = vld [vmem:[%s680_s1] sm:$0x3]  ;;  %s617_s1 = smov [#allocation5]  }
  0x15   :  { %v29_v6 = vld [vmem:[%s681_s2] sm:$0x3]  ;;  %s495_s2 = sshll.u32 %s617_s1, 4  ;;  %s496_s2 = int_to_ptr.vmem [resolvable:$true] %s495_s2 }
  0x16   :  { %v30_v7 = vadd.f32 %v29_v6, %v28_v5  ;;  %v108_v8 = vand.u32 4294901760, %v107_v3  ;;  %s586_s27 = scalar_lea.vmem %s496_s2, 16  ;;  %s590_s28 = scalar_lea.vmem %s496_s2, 32 }
  0x17   :  { %p587_p8 = scmp.ne.s32.totalorder %s496_s2, %s586_s27  ;;  %p591_p9 = scmp.lt.s32.totalorder %s496_s2, %s496_s2 }
  0x18   :  { %v31_v9 = vsub.f32 %v30_v7, %v27_v4  ;;  %v109_v11 = vsub.f32 %v107_v3, %v108_v8  ;;  %p592_p10 = scmp.lt.s32.totalorder %s590_s28, %s586_s27 }
  0x1a   :  { %v32_v10 = vand.u32 2147483647, %v31_v9  ;;  %v110_v14 = vand.u32 4294901760, %v109_v11  ;;  %p593_p11 = por %p592_p10, %p591_p9 }
  0x1c   :  { %v38_v12 = vsel %vm33_vm0, %v32_v10, 0  ;;  %p594_p12 = pnand %p593_p11, %p587_p8 }
  0x1d   :  { %v41_v13 = vand.u32 4294901760, %v38_v12 }
  0x1f   :  { %520 = vmatpush3.xpose.msra.mxu1 %v41_v13  ;;  %v118_v15 = vsub.f32 %v38_v12, %v41_v13  ;;  %535 = vmatpush3.xpose.msra.mxu0 %v41_v13 }
  0x20   :  { %524 = vmatprep.subr.mxu1 %v613_v0  ;;  %539 = vmatprep.subr.mxu0 %v613_v0 }
  0x21   :  { %v119_v16 = vand.u32 4294901760, %v118_v15 }
  0x22   :  { %522 = vmatmul.mubr.f32.vlgmr.msra.gmra.mrb[0].mxu1 %v110_v14  ;;  %537 = vmatmul.mubr.f32.vlgmr.msra.gmra.mrb[0].mxu0 %v108_v8 }
  0x23   :  { %v120_v17 = vsub.f32 %v118_v15, %v119_v16  ;;  %540 = vmatpush3.xpose.msra.mxu0 %v119_v16  ;;  %526 = vmatprep.mubr.msk.f32.mxu1 %vm615_vm1, %v613_v0 }
  0x24   :  { %541 = vmatprep.mubr.msk.f32.mxu0 %vm615_vm1, %v613_v0  ;;  %544 = vmatprep.subr.mxu0 %v613_v0 }
  0x25   :  { %v121_v18 = vand.u32 4294901760, %v120_v17 }
  0x27   :  { %525 = vmatpush3.xpose.msra.mxu1 %v121_v18 }
  0x28   :  { %529 = vmatprep.subr.mxu1 %v613_v0 }
  0x2a   :  { %527 = vmatmul.mubr.msk.f32.vlgmr.msra.gmra.mrb[0].mxu1 %vm33_vm0, %v616_v19  ;;  %542 = vmatmul.mubr.msk.f32.vlgmr.msra.gmra.mrb[0].mxu0 %vm33_vm0, %v616_v19 }
  0x2b   :  { %530 = vmatpush3.xpose.msra.mxu1 %v118_v15  ;;  %545 = vmatpush3.xpose.msra.mxu0 %v41_v13 }
  0x2c   :  { %531 = vmatprep.mubr.msk.f32.mxu1 %vm615_vm1, %v613_v0  ;;  %546 = vmatprep.mubr.msk.f32.mxu0 %vm615_vm1, %v613_v0 }
  0x32   :  { %532 = vmatmul.mubr.f32.vlgmr.msra.gmra.mrb[0].mxu1 %v107_v3  ;;  %547 = vmatmul.mubr.msk.f32.vlgmr.msra.gmra.mrb[0].mxu0 %vm33_vm0, %v616_v19 }
 0x105   :  { %v262_v20 = vpop.f32.mrb[0].mxu1  ;;  %v482_v21 = vpop.f32.mrb[0].mxu0 }
 0x106   :  { %v549_v22 = vadd.f32 %v482_v21, %v262_v20  ;;  %v533_v23 = vpop.f32.mrb[1].mxu1  ;;  %v548_v24 = vpop.f32.mrb[1].mxu0 }
 0x108   :  { %v486_v25 = vsub.f32 12.0, %v549_v22 }
 0x10a   :  { %488 = vst.msk [vmem:[#allocation5] sm:$0x1] %vm487_vm2, %v486_v25 }
 0x10b   :  { %597 = shalt.err (!%p594_p12)
}
 0x10c   :  { %s598_s4 = scalar_lea.hbm %s682_s3, 16 }
 0x10d   :  { %p599_p13 = scmp.ne.s32.totalorder %s682_s3, %s598_s4  ;;  %p602_p0 = scmp.lt.u32.totalorder %s598_s4, %s682_s3 }
 0x10f   :  { %p604_p1 = pnand %p602_p0, %p599_p13 }
 0x111   :  { %607 = shalt.err (!%p604_p1)
}
 0x112   :  { %498 = dma.vmem_to_hbm [thread:$0]  %s496_s2, 16, %s682_s3, [#allocation4]  }
 0x113   :  { %610 = dma.done.wait [#allocation4], 16  }
 0x114   :  { %611 = vsyncadd [#allocation4], 4294967280 }
 0x115   :  { %502 = vsyncpa [#allocation3], 1 }
 0x116   :  { %503 = vsyncpa [#allocation4], 1 }

</bundles_post_ra>
